<compile_context>
chip_gen: v5e
topology: v5e:2x2
jax: 0.10.0
libtpu: 0.0.40
codegen_flags: <defaults>
</compile_context>

<pallas_src>
import math
from functools import partial

import jax
import jax.numpy as jnp
from jax import lax
from jax.experimental import pallas as pl
from jax.experimental.pallas import tpu as pltpu


def _attention_kernel(q_ref, k_ref, v_ref, wqt_ref, wkt_ref, wvt_ref, o_ref, *,
                      block_b, num_q, num_k):
    """One grid step processes `block_b` batches.

    q_ref:            (block_b * num_q, D_in)   -- (batch, node) folded into rows
    k_ref / v_ref:    (block_b * num_k, D_in)
    wqt/wkt/wvt_ref:  (D_in, D_hid)             -- pre-transposed; 1/sqrt(dk) folded into wqt
    o_ref:            (block_b * num_q, D_hid)
    """
    # --- Projections: batch folded into M so the MXU sees one tall matmul each. ---
    # Weights already (D_in, D_hid): no in-kernel .T (no XLU vxpose competing with MXU pushes).
    q_proj = jnp.dot(q_ref[...], wqt_ref[...], preferred_element_type=jnp.float32)
    k_proj = jnp.dot(k_ref[...], wkt_ref[...], preferred_element_type=jnp.float32)
    v_proj = jnp.dot(v_ref[...], wvt_ref[...], preferred_element_type=jnp.float32)

    d_hid = q_proj.shape[-1]
    # Leading-dim split only (num_q / num_k are sublane-aligned here) -> cheap reshape.
    q3 = q_proj.reshape(block_b, num_q, d_hid)
    k3 = k_proj.reshape(block_b, num_k, d_hid)
    v3 = v_proj.reshape(block_b, num_k, d_hid)

    # scores[b, q, k] = sum_d q3[b, q, d] * k3[b, k, d]   (K^T never materialized).
    scores = lax.dot_general(
        q3, k3, (((2,), (2,)), ((0,), (0,))), preferred_element_type=jnp.float32)

    # Numerically stable softmax over keys, all in f32.
    m = jnp.max(scores, axis=-1, keepdims=True)
    e = jnp.exp(scores - m)
    denom = jnp.sum(e, axis=-1, keepdims=True)
    # (pl.reciprocal(..., approx=True) would push the divide onto the otherwise-idle EUP
    #  slot; kept exact here to stay bit-close to the f32 reference.)
    p = e * pl.reciprocal(denom, approx=False)

    out = lax.dot_general(
        p, v3, (((2,), (1,)), ((0,), (0,))), preferred_element_type=jnp.float32)

    o_ref[...] = out.reshape(block_b * num_q, d_hid).astype(o_ref.dtype)


def _pick_block_batch(batch, num_q, num_k, target_rows=512):
    """Pick batches-per-grid-step: sublane-aligned blocks, decent M for the MXU,
    and >=2 grid steps when possible (v7x megacore)."""
    candidates = []
    for bt in range(1, batch + 1):
        if batch % bt:
            continue
        full = (bt == batch)
        if (bt * num_q) % 8 and not full:
            continue
        if (bt * num_k) % 8 and not full:
            continue
        candidates.append(bt)
    multi = [bt for bt in candidates if batch // bt >= 2 and bt * num_q <= target_rows]
    if multi:
        return max(multi)
    within = [bt for bt in candidates if bt * num_q <= target_rows]
    return max(within) if within else min(candidates)


def attention_forward(querys, keys, values, wq, wk, wv):
    """Dot-product attention matching the PyTorch Attention.forward (attention_type='dot')."""
    B, Nq, D_in = querys.shape
    _, Nk, _ = keys.shape
    D_hid = wq.shape[0]

    Bt = _pick_block_batch(B, Nq, Nk)
    grid = (B // Bt,)

    # One-time XLA-side prep: pre-transpose weights; fold 1/sqrt(dk) into the Q weight.
    scale = 1.0 / math.sqrt(D_hid)
    wqt = (wq * scale).T          # (D_in, D_hid)
    wkt = wk.T
    wvt = wv.T

    # Fold (batch, node) into rows — free metadata reshape at the XLA level.
    q2 = querys.reshape(B * Nq, D_in)
    k2 = keys.reshape(B * Nk, D_in)
    v2 = values.reshape(B * Nk, D_in)

    kernel = partial(_attention_kernel, block_b=Bt, num_q=Nq, num_k=Nk)

    out2 = pl.pallas_call(
        kernel,
        out_shape=jax.ShapeDtypeStruct((B * Nq, D_hid), jnp.float32),
        grid_spec=pltpu.PrefetchScalarGridSpec(
            num_scalar_prefetch=0,
            grid=grid,
            in_specs=[
                pl.BlockSpec((Bt * Nq, D_in), lambda b: (b, 0)),
                pl.BlockSpec((Bt * Nk, D_in), lambda b: (b, 0)),
                pl.BlockSpec((Bt * Nk, D_in), lambda b: (b, 0)),
                pl.BlockSpec((D_in, D_hid), lambda b: (0, 0)),   # weights: resident block
                pl.BlockSpec((D_in, D_hid), lambda b: (0, 0)),
                pl.BlockSpec((D_in, D_hid), lambda b: (0, 0)),
            ],
            out_specs=pl.BlockSpec((Bt * Nq, D_hid), lambda b: (b, 0)),
        ),
        compiler_params=pltpu.CompilerParams(
            dimension_semantics=("parallel",),
        ),
    )(q2, k2, v2, wqt, wkt, wvt)

    return out2.reshape(B, Nq, D_hid)


def attention_reference(querys, keys, values, wq, wk, wv):
    """Pure-JAX reference mirroring the PyTorch module."""
    Q = querys @ wq.T
    K = keys @ wk.T
    V = values @ wv.T
    dim_k = wq.shape[0]
    scores = (Q @ jnp.swapaxes(K, -1, -2)) / math.sqrt(dim_k)
    p = jax.nn.softmax(scores, axis=-1)
    return p @ V


if __name__ == "__main__":
    # querys/keys/values: (batch, num_nodes, input_dim), as in the PyTorch module.
    batch, num_nodes, input_dim, hidden_dim = 2, 8, 16, 32

    key = jax.random.PRNGKey(0)
    kq, kk, kv, kwq, kwk, kwv = jax.random.split(key, 6)

    querys = jax.random.normal(kq, (batch, num_nodes, input_dim), dtype=jnp.float32)
    keys = jax.random.normal(kk, (batch, num_nodes, input_dim), dtype=jnp.float32)
    values = jax.random.normal(kv, (batch, num_nodes, input_dim), dtype=jnp.float32)

    # nn.Linear weight layout: (out_features, in_features); bias=False in the module.
    wq = jax.random.normal(kwq, (hidden_dim, input_dim), dtype=jnp.float32) * (1.0 / math.sqrt(input_dim))
    wk = jax.random.normal(kwk, (hidden_dim, input_dim), dtype=jnp.float32) * (1.0 / math.sqrt(input_dim))
    wv = jax.random.normal(kwv, (hidden_dim, input_dim), dtype=jnp.float32) * (1.0 / math.sqrt(input_dim))

    out = attention_forward(querys, keys, values, wq, wk, wv)
    out = jax.block_until_ready(out)

    ref = attention_reference(querys, keys, values, wq, wk, wv)
    assert out.shape == (batch, num_nodes, hidden_dim)
    assert jnp.allclose(out, ref, atol=1e-4, rtol=1e-4), "Pallas output mismatch vs reference"

    print("KERNEL_OK")
</pallas_src>

<mosaic_0001>
module attributes {stable_mosaic.version = 11 : i64} {
  func.func @_attention_kernel(%arg0: i32, %arg1: memref<8x16xf32, #tpu.memory_space<vmem>>, %arg2: memref<8x16xf32, #tpu.memory_space<vmem>>, %arg3: memref<8x16xf32, #tpu.memory_space<vmem>>, %arg4: memref<16x32xf32, #tpu.memory_space<vmem>>, %arg5: memref<16x32xf32, #tpu.memory_space<vmem>>, %arg6: memref<16x32xf32, #tpu.memory_space<vmem>>, %arg7: memref<8x32xf32, #tpu.memory_space<vmem>>) attributes {dimension_semantics = [#tpu.dimension_semantics<parallel>], iteration_bounds = array<i64: 2>, scalar_prefetch = 0 : i64, scratch_operands = 0 : i64, tpu.core_type = #tpu.core_type<tc>, window_params = [{transform_indices = @transform_0, window_bounds = array<i64: 8, 16>}, {transform_indices = @transform_1, window_bounds = array<i64: 8, 16>}, {transform_indices = @transform_2, window_bounds = array<i64: 8, 16>}, {pipeline_mode = #tpu.pipeline_mode<synchronous>, transform_indices = @transform_3, window_bounds = array<i64: 16, 32>}, {pipeline_mode = #tpu.pipeline_mode<synchronous>, transform_indices = @transform_4, window_bounds = array<i64: 16, 32>}, {pipeline_mode = #tpu.pipeline_mode<synchronous>, transform_indices = @transform_5, window_bounds = array<i64: 16, 32>}, {transform_indices = @transform_6, window_bounds = array<i64: 8, 32>}]} {
    %c0 = arith.constant 0 : index
    %c0_0 = arith.constant 0 : index
    %0 = vector.load %arg1[%c0, %c0_0] : memref<8x16xf32, #tpu.memory_space<vmem>>, vector<8x16xf32>
    %c0_1 = arith.constant 0 : index
    %c0_2 = arith.constant 0 : index
    %1 = vector.load %arg4[%c0_1, %c0_2] : memref<16x32xf32, #tpu.memory_space<vmem>>, vector<16x32xf32>
    %cst = arith.constant dense<0.000000e+00> : vector<8x32xf32>
    %2 = tpu.matmul %0, %1, %cst {dimension_numbers = #tpu.dot_dimension_numbers<[1], [0], [0], [1], [0, 0, 1, 1], [], []>} : vector<8x16xf32>, vector<16x32xf32>, vector<8x32xf32> -> vector<8x32xf32>
    %c0_3 = arith.constant 0 : index
    %c0_4 = arith.constant 0 : index
    %3 = vector.load %arg2[%c0_3, %c0_4] : memref<8x16xf32, #tpu.memory_space<vmem>>, vector<8x16xf32>
    %c0_5 = arith.constant 0 : index
    %c0_6 = arith.constant 0 : index
    %4 = vector.load %arg5[%c0_5, %c0_6] : memref<16x32xf32, #tpu.memory_space<vmem>>, vector<16x32xf32>
    %cst_7 = arith.constant dense<0.000000e+00> : vector<8x32xf32>
    %5 = tpu.matmul %3, %4, %cst_7 {dimension_numbers = #tpu.dot_dimension_numbers<[1], [0], [0], [1], [0, 0, 1, 1], [], []>} : vector<8x16xf32>, vector<16x32xf32>, vector<8x32xf32> -> vector<8x32xf32>
    %c0_8 = arith.constant 0 : index
    %c0_9 = arith.constant 0 : index
    %6 = vector.load %arg3[%c0_8, %c0_9] : memref<8x16xf32, #tpu.memory_space<vmem>>, vector<8x16xf32>
    %c0_10 = arith.constant 0 : index
    %c0_11 = arith.constant 0 : index
    %7 = vector.load %arg6[%c0_10, %c0_11] : memref<16x32xf32, #tpu.memory_space<vmem>>, vector<16x32xf32>
    %cst_12 = arith.constant dense<0.000000e+00> : vector<8x32xf32>
    %8 = tpu.matmul %6, %7, %cst_12 {dimension_numbers = #tpu.dot_dimension_numbers<[1], [0], [0], [1], [0, 0, 1, 1], [], []>} : vector<8x16xf32>, vector<16x32xf32>, vector<8x32xf32> -> vector<8x32xf32>
    %9 = vector.shape_cast %2 : vector<8x32xf32> to vector<1x8x32xf32>
    %10 = vector.shape_cast %5 : vector<8x32xf32> to vector<1x8x32xf32>
    %11 = vector.shape_cast %8 : vector<8x32xf32> to vector<1x8x32xf32>
    %cst_13 = arith.constant dense<0.000000e+00> : vector<1x8x8xf32>
    %12 = tpu.matmul %9, %10, %cst_13 {dimension_numbers = #tpu.dot_dimension_numbers<[2], [2], [1], [1], [0, 0, 0, 1, 1, 1], [0], [0]>} : vector<1x8x32xf32>, vector<1x8x32xf32>, vector<1x8x8xf32> -> vector<1x8x8xf32>
    %cst_14 = arith.constant dense<0xFF800000> : vector<1x8xf32>
    %13 = vector.multi_reduction <maximumf>, %12, %cst_14 [2] : vector<1x8x8xf32> to vector<1x8xf32>
    %14 = vector.shape_cast %13 : vector<1x8xf32> to vector<1x8x1xf32>
    %15 = vector.broadcast %14 : vector<1x8x1xf32> to vector<1x8x8xf32>
    %16 = arith.subf %12, %15 : vector<1x8x8xf32>
    %17 = math.exp %16 : vector<1x8x8xf32>
    %cst_15 = arith.constant dense<0.000000e+00> : vector<1x8xf32>
    %18 = vector.multi_reduction <add>, %17, %cst_15 [2] : vector<1x8x8xf32> to vector<1x8xf32>
    %19 = vector.shape_cast %18 : vector<1x8xf32> to vector<1x8x1xf32>
    %20 = tpu.reciprocal %19 : vector<1x8x1xf32> -> vector<1x8x1xf32>
    %21 = vector.broadcast %20 : vector<1x8x1xf32> to vector<1x8x8xf32>
    %22 = arith.mulf %17, %21 : vector<1x8x8xf32>
    %cst_16 = arith.constant dense<0.000000e+00> : vector<1x8x32xf32>
    %23 = tpu.matmul %22, %11, %cst_16 {dimension_numbers = #tpu.dot_dimension_numbers<[2], [1], [1], [2], [0, 0, 0, 1, 1, 2], [0], [0]>} : vector<1x8x8xf32>, vector<1x8x32xf32>, vector<1x8x32xf32> -> vector<1x8x32xf32>
    %24 = vector.shape_cast %23 : vector<1x8x32xf32> to vector<8x32xf32>
    %c0_17 = arith.constant 0 : index
    %c0_18 = arith.constant 0 : index
    %25 = vector.load %arg7[%c0_17, %c0_18] : memref<8x32xf32, #tpu.memory_space<vmem>>, vector<8x32xf32>
    tpu.vector_store %arg7[%c0_17, %c0_18], %24 {strides = array<i32>} : memref<8x32xf32, #tpu.memory_space<vmem>>, vector<8x32xf32>,
    return
  }
  func.func @transform_0(%arg0: i32) -> (i32, i32) {
    %c0_i32 = arith.constant 0 : i32
    %c0_i32_0 = arith.constant 0 : i32
    return %arg0, %c0_i32 : i32, i32
  }
  func.func @transform_1(%arg0: i32) -> (i32, i32) {
    %c0_i32 = arith.constant 0 : i32
    %c0_i32_0 = arith.constant 0 : i32
    return %arg0, %c0_i32 : i32, i32
  }
  func.func @transform_2(%arg0: i32) -> (i32, i32) {
    %c0_i32 = arith.constant 0 : i32
    %c0_i32_0 = arith.constant 0 : i32
    return %arg0, %c0_i32 : i32, i32
  }
  func.func @transform_3(%arg0: i32) -> (i32, i32) {
    %c0_i32 = arith.constant 0 : i32
    %c0_i32_0 = arith.constant 0 : i32
    %c0_i32_1 = arith.constant 0 : i32
    return %c0_i32, %c0_i32_0 : i32, i32
  }
  func.func @transform_4(%arg0: i32) -> (i32, i32) {
    %c0_i32 = arith.constant 0 : i32
    %c0_i32_0 = arith.constant 0 : i32
    %c0_i32_1 = arith.constant 0 : i32
    return %c0_i32, %c0_i32_0 : i32, i32
  }
  func.func @transform_5(%arg0: i32) -> (i32, i32) {
    %c0_i32 = arith.constant 0 : i32
    %c0_i32_0 = arith.constant 0 : i32
    %c0_i32_1 = arith.constant 0 : i32
    return %c0_i32, %c0_i32_0 : i32, i32
  }
  func.func @transform_6(%arg0: i32) -> (i32, i32) {
    %c0_i32 = arith.constant 0 : i32
    %c0_i32_0 = arith.constant 0 : i32
    return %arg0, %c0_i32 : i32, i32
  }
}

</mosaic_0001>

<bundles_post_ra>
// kernel: tpu_custom_call.1
= control target key start
LH: loop header
LB: loop body
LE: loop exit
PB: predicated region body
PF: predicated region fallthrough
CT: control target
= control target key end

     0   :  { %s1365_s0 = inlined_call_operand.hbm [shape: f32[16,16], index: 0, kind: input, shape index: {}]   ;;  %s1366_s1 = inlined_call_operand.hbm [shape: f32[16,16], index: 1, kind: input, shape index: {}]   ;;  %s1367_s2 = inlined_call_operand.hbm [shape: f32[16,16], index: 2, kind: input, shape index: {}]   ;;  %s1368_s3 = inlined_call_operand.hbm [shape: f32[16,32], index: 3, kind: input, shape index: {}]   ;;  %s1369_s4 = inlined_call_operand.hbm [shape: f32[16,32], index: 4, kind: input, shape index: {}]   ;;  %s1370_s5 = inlined_call_operand.hbm [shape: f32[16,32], index: 5, kind: input, shape index: {}]   ;;  %s1371_s6 = inlined_call_operand.hbm [shape: f32[16,32], index: 6, kind: output, shape index: {}]  }
   0x1   :  { %1382 = sst [smem:[#allocation23_spill]] %s1366_s1 }
   0x2   :  { %1383 = sst [smem:[#allocation24_spill]] %s1368_s3 }
   0x3   :  { %11 = vsyncpa [#allocation3], 0 }
   0x4   :  { %13 = vsyncpa [#allocation3 + $0x1], 0 }
   0x5   :  { %14 = vsyncpa [#allocation6], 0 }
   0x6   :  { %16 = vsyncpa [#allocation6 + $0x1], 0 }
   0x7   :  { %17 = vsyncpa [#allocation9], 0 }
   0x8   :  { %18 = vsyncpa [#allocation12], 0 }
   0x9   :  { %19 = vsyncpa [#allocation4], 0 }
   0xa   :  { %21 = vsyncpa [#allocation4 + $0x1], 0  ;;  %s1130_s21 = smov 0   ;;  %s1132_s22 = smov 0  }
   0xb   :  { %s1134_s23 = smov 0   ;;  %s1136_s24 = smov 0  }
   0xc LB: > { %1384 = sst [smem:[#allocation19_spill]] %s1088_s24  ;;  %s1154_s28 = sadd.s32 4294967295, %s1088_s24   ;;  %s1088_s24 = sphi %s1136_s24, %s1406_s24   ;;  %s1084_s23 = sphi %s1134_s23, %s1410_s23   ;;  %s1080_s22 = sphi %s1132_s22, %s1409_s22   ;;  %s1076_s21 = sphi %s1130_s21, %s1408_s21  }
   0xd   : > { %s1385_s3 = sld [smem:[#allocation24_spill]]  ;;  %p708_p0 = scmp.ge.s32.totalorder %s1088_s24, 1 }
   0xe   : > { %p1381_p1 = scmp.eq.s32.totalorder %s1154_s28, 0  ;;  %p199_p2 = scmp.lt.s32.totalorder %s1088_s24, 3 }
   0xf   : > { %s1090_s30 = smov [#allocation8]   ;;  %s1372_s9 = smov 128  }
  0x10   : > { %p1159_p3 = pnand %p708_p0, %p199_p2  ;;  %s212_s7 = sshll.u32 %s1090_s30, 4  ;;  %s213_s7 = int_to_ptr.vmem [resolvable:$true] %s212_s7 }
  0x11   : > { %s1375_s10 = smov 8   ;;  %s707_s11 = sadd.s32 4294967294, %s1088_s24  }
  0x12   : > { %p757_p4 = pneg %p1159_p3  ;;  %s1179_s12 = sadd.s32 1, %s1088_s24  }
  0x13   : > { %s210_s27 = sshll.u32 %s1385_s3, 4  ;;  %1388 = sst [smem:[#allocation20_spill]] %s1179_s12  ;;  %s211_s27 = int_to_ptr.hbm [resolvable:$true] %s210_s27 }
  0x14   : > { %p1168_p6 = pnand %p757_p4, %p1381_p1  ;;  %s34_s13 = sadd.s32 1, %s1084_s23 }
  0x15   : > { %s31_s14 = ssub.s32 %s1088_s24, %s1179_s12  ;;  %p41_p7 = scmp.ne.s32.totalorder %s1084_s23, %s1080_s22 }
  0x16   : > { %760 = dma.hbm_to_vmem [thread:$0]  (!%p1168_p6), %s211_s27, 256, %s213_s7, [#allocation9], %s1372_s9, %s1372_s9, %s1375_s10  }
  0x17   : > { %p32_p8 = scmp.eq.s32.totalorder %s31_s14, 0  ;;  %p42_p9 = scmp.eq.s32.totalorder %s1088_s24, 0 }
  0x18   : > { %p47_p10 = scmp.ne.s32.totalorder %s1080_s22, %s1076_s21  ;;  %p186_p11 = scmp.eq.s32.totalorder %s1154_s28, 1 }
  0x19   : > { %s1191_s15 = scalar_select %p32_p8, %s1084_s23, %s34_s13  }
  0x1a   : > { %p43_p12 = por %p42_p9, %p41_p7  ;;  %p1195_p13 = por %p1381_p1, %p47_p10 }
  0x1b   : > { %1389 = sst [smem:[#allocation21_spill]] %s1191_s15  ;;  %p1199_p0 = por %p186_p11, %p41_p7 }
  0x1c   : > { %p192_p2 = scmp.eq.s32.totalorder %s707_s11, 1  ;;  %p784_p4 = scmp.lt.s32.totalorder %s1088_s24, 2 }
  0x1d   : > { %s1374_s18 = sand.u32 1, %s1084_s23   ;;  %s1214_s25 = sshll.u32 %s1088_s24, 3 }
  0x1e   : > { %p1205_p5 = por %p192_p2, %p47_p10  ;;  %s1211_s20 = sshll.u32 %s1374_s18, 3 }
  0x1f   : > { %p1216_p8 = pnand %p784_p4, %p43_p12  ;;  %s273_s27 = sand.u32 1, %s1088_s24  }
  0x20   : > { %s1392_s19 = scalar_select %p1205_p5, 1, 0 }
  0x21   : > { %s1395_s1 = sld [smem:[#allocation23_spill]]  ;;  %s277_s13 = scalar_lea.vmem [#allocation5], %s1211_s20 }
  0x22   : > { %1393 = sst [smem:[#allocation22_spill]] %s1392_s19  ;;  %s285_s14 = sshll.u32 %s277_s13, 4  ;;  %s286_s14 = int_to_ptr.vmem [resolvable:$true] %s285_s14 }
  0x23   : > { %s224_s3 = sshll.u32 %s1369_s4, 4  ;;  %s1229_s15 = scalar_lea.sflag [#allocation6], %s273_s27  ;;  %s225_s3 = int_to_ptr.hbm [resolvable:$true] %s224_s3 }
  0x24   : > { %p864_p9 = pneg %p1216_p8 }
  0x27   : > { %s281_s11 = scalar_lea.hbm %s1395_s1, %s1214_s25 }
  0x28   : > { %s283_s9 = sshll.u32 %s281_s11, 4  ;;  %s867_s11 = scalar_lea.hbm %s1395_s1, 16  ;;  %s284_s9 = int_to_ptr.hbm [resolvable:$true] %s283_s9 }
  0x29   : > { %s860_s12 = sshra.s32 %s284_s9, 4  ;;  %s861_s12 = int_to_ptr.hbm [resolvable:$true] %s860_s12 }
  0x2a   : > { %s862_s19 = scalar_lea.hbm %s861_s12, 8  ;;  %p868_p12 = scmp.lt.s32.totalorder %s861_s12, %s1395_s1 }
  0x2b   : > { %p863_p7 = scmp.ne.s32.totalorder %s861_s12, %s862_s19  ;;  %p869_p2 = scmp.lt.s32.totalorder %s867_s11, %s862_s19 }
  0x2d   : > { %p865_p10 = pnand %p864_p9, %p863_p7  ;;  %p870_p4 = por %p869_p2, %p868_p12 }
  0x2f   : > { %p866_p11 = pneg %p865_p10 }
  0x31   : > { %p871_p1 = pnand %p870_p4, %p866_p11 }
  0x33   : > { %874 = shalt.err (!%p871_p1)
}
  0x34   : > { %773 = dma.hbm_to_vmem [thread:$0]  (!%p1216_p8), %s284_s9, 128, %s286_s14, %s1229_s15  }
  0x35   : > { %s1093_s10 = smov [#allocation10]   ;;  %s238_s24 = sshll.u32 %s1370_s5, 4  ;;  %s239_s24 = int_to_ptr.hbm [resolvable:$true] %s238_s24 }
  0x36   : > { %s226_s18 = sshll.u32 %s1093_s10, 4  ;;  %s1396_s12 = smov 8   ;;  %s227_s18 = int_to_ptr.vmem [resolvable:$true] %s226_s18 }
  0x37   : > { %s1397_s19 = smov 128   ;;  %s1094_s7 = smov [#allocation11]  }
  0x38   : > { %763 = dma.hbm_to_vmem [thread:$0]  (!%p1168_p6), %s225_s3, 256, %s227_s18, [#allocation9], %s1397_s19, %s1397_s19, %s1396_s12  }
  0x39   : > { %s240_s11 = sshll.u32 %s1094_s7, 4  ;;  %s262_s13 = scalar_lea.hbm %s1365_s0, %s1214_s25  ;;  %s241_s11 = int_to_ptr.vmem [resolvable:$true] %s240_s11 }
  0x3a   : > { %766 = dma.hbm_to_vmem [thread:$0]  (!%p1168_p6), %s239_s24, 256, %s241_s11, [#allocation12], %s1397_s19, %s1397_s19, %s1396_s12  }
  0x3b   : > { %s264_s10 = sshll.u32 %s262_s13, 4  ;;  %s258_s27 = scalar_lea.vmem [#allocation2], %s1211_s20  ;;  %s265_s10 = int_to_ptr.hbm [resolvable:$true] %s264_s10 }
  0x3c   : > { %s266_s30 = sshll.u32 %s258_s27, 4  ;;  %s1398_s1 = sand.u32 1, %s1084_s23   ;;  %s267_s30 = int_to_ptr.vmem [resolvable:$true] %s266_s30 }
  0x3d   : > { %s255_s3 = scalar_lea.sflag [#allocation3], %s1398_s1  ;;  %s950_s18 = sshra.s32 %s265_s10, 4  ;;  %s951_s18 = int_to_ptr.hbm [resolvable:$true] %s950_s18 }
  0x3e   : > { %s952_s7 = scalar_lea.hbm %s951_s18, 8  ;;  %s957_s14 = scalar_lea.hbm %s1365_s0, 16 }
  0x3f   : > { %p953_p1 = scmp.ne.s32.totalorder %s951_s18, %s952_s7  ;;  %p958_p6 = scmp.lt.s32.totalorder %s951_s18, %s1365_s0 }
  0x40   : > { %p959_p11 = scmp.lt.s32.totalorder %s957_s14, %s952_s7 }
  0x41   : > { %p955_p7 = pnand %p953_p1, %p864_p9 }
  0x42   : > { %p960_p12 = por %p959_p11, %p958_p6 }
  0x43   : > { %p956_p10 = pneg %p955_p7 }
  0x45   : > { %p961_p2 = pnand %p960_p12, %p956_p10 }
  0x47   : > { %964 = shalt.err (!%p961_p2)
}
  0x48   : > { %770 = dma.hbm_to_vmem [thread:$0]  (!%p1216_p8), %s265_s10, 128, %s267_s30, %s255_s3  }
  0x49   : > { %s300_s11 = scalar_lea.hbm %s1367_s2, %s1214_s25  ;;  %s296_s27 = scalar_lea.vmem [#allocation7], %s1211_s20 }
  0x4a   : > { %s302_s13 = sshll.u32 %s300_s11, 4  ;;  %s304_s8 = sshll.u32 %s296_s27, 4  ;;  %s303_s13 = int_to_ptr.hbm [resolvable:$true] %s302_s13  ;;  %s305_s8 = int_to_ptr.vmem [resolvable:$true] %s304_s8 }
  0x4b   : > { %s980_s18 = sshra.s32 %s303_s13, 4  ;;  %s987_s10 = scalar_lea.hbm %s1367_s2, 16  ;;  %s981_s18 = int_to_ptr.hbm [resolvable:$true] %s980_s18 }
  0x4c   : > { %s982_s7 = scalar_lea.hbm %s981_s18, 8  ;;  %p988_p10 = scmp.lt.s32.totalorder %s981_s18, %s1367_s2 }
  0x4d   : > { %p983_p4 = scmp.ne.s32.totalorder %s981_s18, %s982_s7  ;;  %p989_p6 = scmp.lt.s32.totalorder %s987_s10, %s982_s7 }
  0x4f   : > { %p985_p1 = pnand %p983_p4, %p864_p9  ;;  %p990_p11 = por %p989_p6, %p988_p10 }
  0x51   : > { %p986_p7 = pneg %p985_p1 }
  0x53   : > { %p991_p12 = pnand %p990_p11, %p986_p7 }
  0x55   : > { %994 = shalt.err (!%p991_p12)
}
  0x56   : > { %776 = dma.hbm_to_vmem [thread:$0]  (!%p1216_p8), %s303_s13, 128, %s305_s8, %s1229_s15  }
  0x57   : > { %313 = sbr.rel (%p1159_p3) target bundleno = 760 (0x2f8), region = 44  ;;  %s1296_s20 = sand.u32 (!%p1159_p3), 1, %s1080_s22  }
  0x58   : > { %s1299_s25 = sshll.u32 (!%p1159_p3), %s1296_s20, 3  ;;  %s316_s24 = scalar_lea.sflag (!%p1159_p3), [#allocation3], %s1296_s20 }
  0x59   : > { %s319_s12 = scalar_lea.vmem (!%p1159_p3), [#allocation2], %s1299_s25 }
  0x5c   : > { %1055 = dma.done.wait (%p1195_p13), %s316_s24, 128  }
  0x5d   : > { %1057 = vsyncadd (%p1195_p13), %s316_s24, 4294967168  ;;  %s325_s29 = sand.u32 1, %s1154_s28   ;;  %s329_s26 = scalar_lea.vmem [#allocation5], %s1299_s25 }
  0x5e   : > { %s326_s15 = scalar_lea.sflag [#allocation6], %s325_s29 }
  0x5f   : > { %1059 = dma.done.wait (%p1195_p13), %s326_s15, 256  }
  0x60   : > { %1061 = vsyncadd (%p1195_p13), %s326_s15, 4294967040  ;;  %s339_s1 = scalar_lea.vmem [#allocation7], %s1299_s25  ;;  %p1399_p3 = scmp.eq.s32.totalorder %s1154_s28, 0 }
  0x62   : > { %1063 = dma.done.wait (%p1399_p3), [#allocation9], 512   ;;  %p1400_p8 = pmov %p1399_p3 }
  0x63   : > { %p1401_p9 = pmov %p1399_p3 }
  0x64   : > { %1065 = vsyncadd (%p1400_p8), [#allocation9], 4294966784 }
  0x65   : > { %1067 = dma.done.wait (%p1401_p9), [#allocation12], 256   ;;  %p1402_p2 = pmov %p1399_p3 }
  0x66   : > { %v423_v0 = vld [vmem:[#allocation10 + $0x8] sm:$0xff]  ;;  %v422_v1 = vld [vmem:[#allocation10] sm:$0xff]  ;;  %v396_v2 = vld [vmem:[#allocation8 + $0x8] sm:$0xff]  ;;  %vm397_vm0 = vcmask 130048   ;;  %vm473_vm1 = vcmask 261120   ;;  %vm500_vm2 = vcmask 64512  }
  0x67   : > { %1069 = vsyncadd (%p1402_p2), [#allocation12], 4294967040  ;;  %441 = vmatpush.msra.mxu1 %v423_v0  ;;  %415 = vmatpush.msra.mxu0 %v396_v2  ;;  %v421_v3 = vld [vmem:[%s329_s26] sm:$0xff]  ;;  %v394_v5 = vld [vmem:[%s319_s12] sm:$0xff]  ;;  %s734_s16 = sshll.u32 %s1154_s28, 3  ;;  %s393_s27 = scalar_lea.vmem [#allocation13], %s1299_s25 }
  0x68   : > { %v395_v4 = vld [vmem:[#allocation8] sm:$0xff]  ;;  %v449_v10 = vld [vmem:[#allocation11 + $0x8] sm:$0xff]  ;;  %v447_v12 = vld [vmem:[%s339_s1] sm:$0xff]  ;;  %s560_s13 = scalar_lea.hbm %s1371_s6, %s734_s16  ;;  %s562_s8 = sshll.u32 %s393_s27, 4  ;;  %s563_s8 = int_to_ptr.vmem [resolvable:$true] %s562_s8 }
  0x69   : > { %442 = vmatpush.msra.mxu1 %v422_v1  ;;  %416 = vmatpush.msra.mxu0 %v395_v4  ;;  %v448_v11 = vld [vmem:[#allocation11] sm:$0xff]  ;;  %s564_s18 = sshll.u32 %s560_s13, 4  ;;  %s550_s7 = scalar_lea.sflag [#allocation4], %s1296_s20  ;;  %s565_s18 = int_to_ptr.hbm [resolvable:$true] %s564_s18 }
  0x6a   : > { %728 = vmatmul.msk.f32.vlgmr.msra.gmra.mxu1 %vm397_vm0, %v421_v3  ;;  %727 = vmatmul.msk.f32.vlgmr.msra.gmra.mxu0 %vm397_vm0, %v394_v5  ;;  %s1024_s9 = sshra.s32 %s565_s18, 4  ;;  %s1030_s30 = scalar_lea.hbm %s1371_s6, 16  ;;  %s1025_s9 = int_to_ptr.hbm [resolvable:$true] %s1024_s9 }
  0x6b   : > { %467 = vmatpush.msra.mxu2 %v449_v10  ;;  %s1026_s14 = scalar_lea.hbm %s1025_s9, 8  ;;  %p1031_p7 = scmp.lt.s32.totalorder %s1025_s9, %s1371_s6 }
  0x6c   : > { %p1027_p13 = scmp.ne.s32.totalorder %s1025_s9, %s1026_s14  ;;  %p1032_p10 = scmp.lt.s32.totalorder %s1030_s30, %s1026_s14 }
  0x6d   : > { %468 = vmatpush.msra.mxu2 %v448_v11 }
  0x6e   : > { %729 = vmatmul.msk.f32.vlgmr.msra.gmra.mxu2 %vm397_vm0, %v447_v12  ;;  %p1028_p4 = pnand %p1027_p13, %p1199_p0  ;;  %p1033_p6 = por %p1032_p10, %p1031_p7 }
  0x70   : > { %p1029_p1 = pneg %p1028_p4 }
  0x72   : > { %p1034_p11 = pnand %p1033_p6, %p1029_p1 }
  0xe7   : > { %v444_v6 = vpop.f32.mrf.mxu1  ;;  %v418_v7 = vpop.f32.mrf.mxu0 }
  0xe8   : > { %730 = vmatpush.xpose.msk.msra.mxu3 %vm473_vm1, %v444_v6 }
  0xeb   : > { %731 = vmatmul.msk.f32.vlgmr.msra.gmra.mxu3 %vm473_vm1, %v418_v7 }
  0xf1   : > { %v470_v18 = vpop.f32.mrf.mxu2 }
  0xf2   : > { %543 = vmatpush.msrb.mxu0 %v470_v18 }
 0x16e   : > { %v497_v8 = vpop.f32.mrf.mxu3 }
 0x16f   : > { %v501_v9 = vsel %vm500_vm2, %v497_v8, -inf }
 0x170   : > { %502 = vmax.xlane.f32.xlu0 %v501_v9 }
 0x1e3   : > { %v503_v13 = vpop.xlane.xlu0 %502 }
 0x1e4   : > { %v504_v14 = vsub.f32 %v497_v8, %v503_v13 }
 0x1e6   : > { %v505_v15 = vmul.f32 1.442695, %v504_v14 }
 0x1e8   : > { %826 = vpow2.f32 %v505_v15 }
 0x1ee   : > { %v827_v16 = vpop.eup %826 }
 0x1ef   : > { %v507_v17 = vsel %vm500_vm2, %v827_v16, 0.0 }
 0x1f0   : > { %508 = vadd.xlane.f32.xlu0 %v507_v17 }
 0x263   : > { %v509_v19 = vpop.xlane.xlu0 %508 }
 0x264   : > { %828 = vrcp.f32 %v509_v19  ;;  %v521_v23 = vand.u32 2147483648, %v509_v19  ;;  %v519_v25 = vand.u32 2147483647, %v509_v19  ;;  %vm515_vm4 = vweird.f32 %v509_v19 }
 0x266   : > { %v522_v27 = vor.u32 1.1754944e-38, %v521_v23  ;;  %vm520_vm6 = vcmp.eq.f32.partialorder %v519_v25, 8.507059e+37 }
 0x26a   : > { %v829_v20 = vpop.eup %828 }
 0x26b   : > { %v511_v21 = vmul.f32 %v829_v20, %v509_v19  ;;  %vm516_vm3 = vweird.f32 %v829_v20 }
 0x26c   : > { %vm517_vm5 = vmor %vm515_vm4, %vm516_vm3 }
 0x26d   : > { %v512_v22 = vsub.f32 1.0, %v511_v21 }
 0x26f   : > { %v513_v24 = vmul.f32 %v829_v20, %v512_v22 }
 0x271   : > { %v514_v26 = vadd.f32 %v829_v20, %v513_v24 }
 0x273   : > { %v518_v28 = vsel %vm517_vm5, %v829_v20, %v514_v26 }
 0x274   : > { %v523_v29 = vsel %vm520_vm6, %v522_v27, %v518_v28 }
 0x275   : > { %v524_v30 = vmul.f32 %v827_v16, %v523_v29 }
 0x277   : > { %732 = vmatmul.msk.f32.vlgmr.msrb.gmra.mxu0 %vm500_vm2, %v524_v30 }
 0x2f4   : > { %v545_v31 = vpop.f32.mrf.mxu0 }
 0x2f5   : > { %548 = vst.msk [vmem:[%s393_s27] sm:$0xff] %vm473_vm1, %v545_v31 }
 0x2f6   : > { %1037 = shalt.err (!%p1034_p11)
}
 0x2f7   : > { %755 = dma.vmem_to_hbm [thread:$0]  (%p1199_p0), %s563_s8, 128, %s565_s18, %s550_s7  }
 0x2f8 PF: > { %s1404_s24 = sld [smem:[#allocation19_spill]]  ;;  %s576_s12 = sand.u32 1, %s1076_s21  }
 0x2f9   : > { %s577_s29 = scalar_lea.sflag [#allocation4], %s576_s12 }
 0x2fe   : > { %p1405_p12 = scmp.ge.s32.totalorder %s1404_s24, 2 }
 0x300   : > { %p778_p3 = pnand %p1405_p12, %p1205_p5 }
 0x302   : > { %p779_p8 = pneg %p778_p3 }
 0x304   : > { %1071 = dma.done.wait (%p779_p8), %s577_s29, 128  }
 0x305   : > { %1073 = vsyncadd (%p779_p8), %s577_s29, 4294967168  ;;  %s1406_s24 = sld [smem:[#allocation20_spill]]  ;;  %s1408_s21 = smov %s1080_s22 }
 0x306   : > { %s1407_s15 = sld [smem:[#allocation21_spill]]  ;;  %s1409_s22 = smov %s1084_s23 }
 0x30b   : > { %p24_p9 = scmp.ge.s32.totalorder %s1406_s24, 4  }
 0x30c   : > { %s1410_s23 = smov %s1407_s15 }
 0x30d   :  { %26 = sbr.rel (!%p24_p9) target bundleno = 12 (0xc), region = 125 }
 0x312   :  { %583 = vsyncpa [#allocation3], 1 }
 0x313   :  { %585 = vsyncpa [#allocation3 + $0x1], 1 }
 0x314   :  { %586 = vsyncpa [#allocation6], 1 }
 0x315   :  { %588 = vsyncpa [#allocation6 + $0x1], 1 }
 0x316   :  { %589 = vsyncpa [#allocation9], 1 }
 0x317   :  { %590 = vsyncpa [#allocation12], 1 }
 0x318   :  { %591 = vsyncpa [#allocation4], 1 }
 0x319   :  { %593 = vsyncpa [#allocation4 + $0x1], 1 }

</bundles_post_ra>
